<compile_context>
chip_gen: v6e
topology: v6e:2x2x1
jax: 0.10.0
libtpu: 0.0.40
codegen_flags: <defaults>
</compile_context>

<pallas_src>
import jax
import jax.numpy as jnp
from jax.experimental import pallas as pl
from jax.experimental.pallas import tpu as pltpu


def _round_up(x, m):
    return (x + m - 1) // m * m


def _slab_layout(state_dim, latent_dim, hidden_layers, action_dim):
    """Row offsets of each weight/bias block inside the packed (R, C) slab."""
    H = len(hidden_layers)
    C = _round_up(max(list(hidden_layers) + [action_dim]), 8)  # slab width
    offs = {}
    r = 0
    offs["w0_state"] = r
    r += _round_up(state_dim, 8)
    offs["w0_z"] = r
    r += _round_up(latent_dim, 8)
    for i in range(1, H):
        offs[f"w{i}"] = r
        r += C
    offs["w_out"] = r
    r += C
    offs["bias"] = r
    r += _round_up(H + 1, 8)
    return offs, r, C


def pack_params(params, state_dim, latent_dim, hidden_layers, action_dim):
    """Pack all (in,out)-layout weights + biases into one zero-padded f32 slab.

    Zero padding composes correctly through the net: padded weight rows/cols
    and padded bias entries contribute exactly 0, and relu(0) == 0.
    """
    offs, R, C = _slab_layout(state_dim, latent_dim, hidden_layers, action_dim)
    H = len(hidden_layers)
    slab = jnp.zeros((R, C), jnp.float32)

    w0, _ = params[0]  # (state_dim + latent_dim, h0), rows ordered [state; z]
    slab = slab.at[offs["w0_state"]:offs["w0_state"] + state_dim, : w0.shape[1]].set(
        w0[:state_dim])
    slab = slab.at[offs["w0_z"]:offs["w0_z"] + latent_dim, : w0.shape[1]].set(
        w0[state_dim:])
    for i in range(1, H):
        wi, _ = params[i]
        slab = slab.at[offs[f"w{i}"]:offs[f"w{i}"] + wi.shape[0], : wi.shape[1]].set(wi)
    w_out, _ = params[H]
    slab = slab.at[offs["w_out"]:offs["w_out"] + w_out.shape[0], : w_out.shape[1]].set(
        w_out)
    for i in range(H + 1):  # one bias row per layer (hidden layers, then head)
        bi = params[i][1].reshape(-1)
        slab = slab.at[offs["bias"] + i, : bi.shape[0]].set(bi)
    return slab


def mlp_forward(z, state, slab, *, state_dim, latent_dim, hidden_layers, action_dim,
                block_b=256):
    """MLP forward in a single pallas_call (signature mirrors torch forward(z, state))."""
    offs, R, C = _slab_layout(state_dim, latent_dim, hidden_layers, action_dim)
    H = len(hidden_layers)
    B = state.shape[0]
    bt = B if B <= block_b else block_b          # batch tile; full batch when small
    grid = (pl.cdiv(B, bt),)

    s_rows = _round_up(state_dim, 8)
    z_rows = _round_up(latent_dim, 8)
    b_rows = _round_up(H + 1, 8)

    def kernel(state_ref, z_ref, slab_ref, out_ref):
        xs = state_ref[...]
        xz = z_ref[...]
        # Aligned block loads from the VMEM-resident slab; static value slices.
        w0s = slab_ref[offs["w0_state"]:offs["w0_state"] + s_rows, :]
        w0z = slab_ref[offs["w0_z"]:offs["w0_z"] + z_rows, :]
        bias = slab_ref[offs["bias"]:offs["bias"] + b_rows, :]

        # Layer 0: cat(state, z) @ W0 + b0, computed as a split matmul.
        h = (jnp.dot(xs, w0s[:state_dim, :], preferred_element_type=jnp.float32)
             + jnp.dot(xz, w0z[:latent_dim, :], preferred_element_type=jnp.float32)
             + bias[0:1, :])
        h = jnp.maximum(h, 0.0)

        # Remaining hidden layers (zero padding keeps padded columns at 0).
        for i in range(1, H):
            wi = slab_ref[offs[f"w{i}"]:offs[f"w{i}"] + C, :]
            h = jnp.maximum(
                jnp.dot(h, wi, preferred_element_type=jnp.float32) + bias[i:i + 1, :],
                0.0)

        # Output head (no activation); drop zero-padded columns on store.
        wf = slab_ref[offs["w_out"]:offs["w_out"] + C, :]
        out = jnp.dot(h, wf, preferred_element_type=jnp.float32) + bias[H:H + 1, :]
        out_ref[...] = out[:, :action_dim]

    return pl.pallas_call(
        kernel,
        out_shape=jax.ShapeDtypeStruct((B, action_dim), jnp.float32),
        grid=grid,
        in_specs=[
            pl.BlockSpec((bt, state_dim), lambda i: (i, 0)),
            pl.BlockSpec((bt, latent_dim), lambda i: (i, 0)),
            pl.BlockSpec((R, C), lambda i: (0, 0)),   # weights stay VMEM-resident
        ],
        out_specs=pl.BlockSpec((bt, action_dim), lambda i: (i, 0)),
        compiler_params=pltpu.CompilerParams(dimension_semantics=("parallel",)),
    )(state, z, slab)


def init_params(key, input_dim, hidden_layers, action_dim):
    """PyTorch Linear-style uniform init; weights stored (in_features, out_features)."""
    dims = [input_dim] + list(hidden_layers) + [action_dim]
    params = []
    for i in range(len(dims) - 1):
        key, kw, kb = jax.random.split(key, 3)
        bound = 1.0 / jnp.sqrt(jnp.float32(dims[i]))
        w = jax.random.uniform(kw, (dims[i], dims[i + 1]), jnp.float32, -bound, bound)
        b = jax.random.uniform(kb, (1, dims[i + 1]), jnp.float32, -bound, bound)
        params.append((w, b))
    return params


def mlp_reference(z, state, params):
    """Pure-JAX reference mirroring the PyTorch forward."""
    x = jnp.concatenate([state, z], axis=1)
    for w, b in params[:-1]:
        x = jnp.maximum(x @ w + b, 0.0)
    w, b = params[-1]
    return x @ w + b


if __name__ == "__main__":
    # Small shapes consistent with the module: input_dim = state_dim + latent_dim.
    B = 8
    state_dim, latent_dim, action_dim = 8, 4, 4
    hidden_layers = [32, 32]

    key = jax.random.PRNGKey(0)
    key, ks, kz = jax.random.split(key, 3)
    state = jax.random.normal(ks, (B, state_dim), jnp.float32)
    z = jax.random.normal(kz, (B, latent_dim), jnp.float32)

    params = init_params(key, state_dim + latent_dim, hidden_layers, action_dim)
    slab = pack_params(params, state_dim, latent_dim, hidden_layers, action_dim)

    out = mlp_forward(z, state, slab,
                      state_dim=state_dim, latent_dim=latent_dim,
                      hidden_layers=hidden_layers, action_dim=action_dim)
    jax.block_until_ready(out)

    ref = mlp_reference(z, state, params)
    assert out.shape == (B, action_dim)
    assert bool(jnp.all(jnp.isfinite(out)))
    assert bool(jnp.allclose(out, ref, atol=1e-2, rtol=1e-2)), (
        f"max abs err {float(jnp.max(jnp.abs(out - ref)))}")

    print("KERNEL_OK")
</pallas_src>

<mosaic_0001>
module attributes {stable_mosaic.version = 11 : i64} {
  func.func @kernel(%arg0: i32, %arg1: memref<8x8xf32, #tpu.memory_space<vmem>>, %arg2: memref<8x4xf32, #tpu.memory_space<vmem>>, %arg3: memref<88x32xf32, #tpu.memory_space<vmem>>, %arg4: memref<8x4xf32, #tpu.memory_space<vmem>>) attributes {dimension_semantics = [#tpu.dimension_semantics<parallel>], iteration_bounds = array<i64: 1>, scalar_prefetch = 0 : i64, scratch_operands = 0 : i64, tpu.core_type = #tpu.core_type<tc>, window_params = [{transform_indices = @transform_0, window_bounds = array<i64: 8, 8>}, {transform_indices = @transform_1, window_bounds = array<i64: 8, 4>}, {pipeline_mode = #tpu.pipeline_mode<synchronous>, transform_indices = @transform_2, window_bounds = array<i64: 88, 32>}, {transform_indices = @transform_3, window_bounds = array<i64: 8, 4>}]} {
    %c0 = arith.constant 0 : index
    %c0_0 = arith.constant 0 : index
    %0 = vector.load %arg1[%c0, %c0_0] : memref<8x8xf32, #tpu.memory_space<vmem>>, vector<8x8xf32>
    %c0_1 = arith.constant 0 : index
    %c0_2 = arith.constant 0 : index
    %1 = vector.load %arg2[%c0_1, %c0_2] : memref<8x4xf32, #tpu.memory_space<vmem>>, vector<8x4xf32>
    %c0_3 = arith.constant 0 : index
    %c0_4 = arith.constant 0 : index
    %2 = vector.load %arg3[%c0_3, %c0_4] : memref<88x32xf32, #tpu.memory_space<vmem>>, vector<8x32xf32>
    %c8 = arith.constant 8 : index
    %c0_5 = arith.constant 0 : index
    %3 = vector.load %arg3[%c8, %c0_5] : memref<88x32xf32, #tpu.memory_space<vmem>>, vector<8x32xf32>
    %c80 = arith.constant 80 : index
    %c0_6 = arith.constant 0 : index
    %4 = vector.load %arg3[%c80, %c0_6] : memref<88x32xf32, #tpu.memory_space<vmem>>, vector<8x32xf32>
    %cst = arith.constant dense<0.000000e+00> : vector<8x32xf32>
    %5 = tpu.matmul %0, %2, %cst {dimension_numbers = #tpu.dot_dimension_numbers<[1], [0], [0], [1], [0, 0, 1, 1], [], []>} : vector<8x8xf32>, vector<8x32xf32>, vector<8x32xf32> -> vector<8x32xf32>
    %6 = vector.extract_strided_slice %3 {offsets = [0, 0], sizes = [4, 32], strides = [1, 1]} : vector<8x32xf32> to vector<4x32xf32>
    %cst_7 = arith.constant dense<0.000000e+00> : vector<8x32xf32>
    %7 = tpu.matmul %1, %6, %cst_7 {dimension_numbers = #tpu.dot_dimension_numbers<[1], [0], [0], [1], [0, 0, 1, 1], [], []>} : vector<8x4xf32>, vector<4x32xf32>, vector<8x32xf32> -> vector<8x32xf32>
    %8 = arith.addf %5, %7 : vector<8x32xf32>
    %9 = vector.extract_strided_slice %4 {offsets = [0, 0], sizes = [1, 32], strides = [1, 1]} : vector<8x32xf32> to vector<1x32xf32>
    %10 = vector.broadcast %9 : vector<1x32xf32> to vector<8x32xf32>
    %11 = arith.addf %8, %10 : vector<8x32xf32>
    %cst_8 = arith.constant 0.000000e+00 : f32
    %12 = vector.broadcast %cst_8 : f32 to vector<8x32xf32>
    %13 = arith.maximumf %11, %12 : vector<8x32xf32>
    %c16 = arith.constant 16 : index
    %c0_9 = arith.constant 0 : index
    %14 = vector.load %arg3[%c16, %c0_9] : memref<88x32xf32, #tpu.memory_space<vmem>>, vector<32x32xf32>
    %cst_10 = arith.constant dense<0.000000e+00> : vector<8x32xf32>
    %15 = tpu.matmul %13, %14, %cst_10 {dimension_numbers = #tpu.dot_dimension_numbers<[1], [0], [0], [1], [0, 0, 1, 1], [], []>} : vector<8x32xf32>, vector<32x32xf32>, vector<8x32xf32> -> vector<8x32xf32>
    %16 = vector.extract_strided_slice %4 {offsets = [1, 0], sizes = [1, 32], strides = [1, 1]} : vector<8x32xf32> to vector<1x32xf32>
    %17 = vector.broadcast %16 : vector<1x32xf32> to vector<8x32xf32>
    %18 = arith.addf %15, %17 : vector<8x32xf32>
    %cst_11 = arith.constant 0.000000e+00 : f32
    %19 = vector.broadcast %cst_11 : f32 to vector<8x32xf32>
    %20 = arith.maximumf %18, %19 : vector<8x32xf32>
    %c48 = arith.constant 48 : index
    %c0_12 = arith.constant 0 : index
    %21 = vector.load %arg3[%c48, %c0_12] : memref<88x32xf32, #tpu.memory_space<vmem>>, vector<32x32xf32>
    %cst_13 = arith.constant dense<0.000000e+00> : vector<8x32xf32>
    %22 = tpu.matmul %20, %21, %cst_13 {dimension_numbers = #tpu.dot_dimension_numbers<[1], [0], [0], [1], [0, 0, 1, 1], [], []>} : vector<8x32xf32>, vector<32x32xf32>, vector<8x32xf32> -> vector<8x32xf32>
    %23 = vector.extract_strided_slice %4 {offsets = [2, 0], sizes = [1, 32], strides = [1, 1]} : vector<8x32xf32> to vector<1x32xf32>
    %24 = vector.broadcast %23 : vector<1x32xf32> to vector<8x32xf32>
    %25 = arith.addf %22, %24 : vector<8x32xf32>
    %26 = vector.extract_strided_slice %25 {offsets = [0, 0], sizes = [8, 4], strides = [1, 1]} : vector<8x32xf32> to vector<8x4xf32>
    %c0_14 = arith.constant 0 : index
    %c0_15 = arith.constant 0 : index
    %27 = vector.load %arg4[%c0_14, %c0_15] : memref<8x4xf32, #tpu.memory_space<vmem>>, vector<8x4xf32>
    tpu.vector_store %arg4[%c0_14, %c0_15], %26 {strides = array<i32>} : memref<8x4xf32, #tpu.memory_space<vmem>>, vector<8x4xf32>,
    return
  }
  func.func @transform_0(%arg0: i32) -> (i32, i32) {
    %c0_i32 = arith.constant 0 : i32
    %c0_i32_0 = arith.constant 0 : i32
    return %arg0, %c0_i32 : i32, i32
  }
  func.func @transform_1(%arg0: i32) -> (i32, i32) {
    %c0_i32 = arith.constant 0 : i32
    %c0_i32_0 = arith.constant 0 : i32
    return %arg0, %c0_i32 : i32, i32
  }
  func.func @transform_2(%arg0: i32) -> (i32, i32) {
    %c0_i32 = arith.constant 0 : i32
    %c0_i32_0 = arith.constant 0 : i32
    %c0_i32_1 = arith.constant 0 : i32
    return %c0_i32, %c0_i32_0 : i32, i32
  }
  func.func @transform_3(%arg0: i32) -> (i32, i32) {
    %c0_i32 = arith.constant 0 : i32
    %c0_i32_0 = arith.constant 0 : i32
    return %arg0, %c0_i32 : i32, i32
  }
}

</mosaic_0001>

<bundles_post_ra>
// kernel: tpu_custom_call.1
= control target key start
LH: loop header
LB: loop body
LE: loop exit
PB: predicated region body
PF: predicated region fallthrough
CT: control target
= control target key end

     0   :  { %vm23_vm0 = vcmask 1043456   ;;  %v399_v0 = vmov 0.0   ;;  %vm19_vm1 = vcmask 31744   ;;  %vm97_vm2 = vcmask 64512   ;;  %s467_s2 = inlined_call_operand.vmem [shape: f32[88,32], index: 2, kind: input, shape index: {}]   ;;  %s468_s1 = inlined_call_operand.vmem [shape: f32[8,4], index: 1, kind: input, shape index: {}]   ;;  %s469_s0 = inlined_call_operand.vmem [shape: f32[8,8], index: 0, kind: input, shape index: {}]   ;;  %s470_s3 = inlined_call_operand.vmem [shape: f32[8,4], index: 3, kind: output, shape index: {}]  }
   0x1   :  { %365 = vmatprep.subr.mxu0 %v399_v0  ;;  %370 = vmatprep.subr.mxu1 %v399_v0  ;;  %v17_v1 = vld [vmem:[%s467_s2 + $0x8] sm:$0xff]  ;;  %v16_v2 = vld [vmem:[%s467_s2] sm:$0xff]  ;;  %vm400_vm3 = vmmov 0   ;;  %v178_v7 = vld [vmem:[%s467_s2 + $0x18] sm:$0xff]  ;;  %v171_v10 = vlaneseq  ;;  %vm185_vm4 = vcmask 261120  }
   0x2   :  { %v15_v3 = vld [vmem:[%s468_s1] sm:$0xff]  ;;  %366 = vmatpush3.msk.msra.mxu0 %vm23_vm0, %v17_v1  ;;  %367 = vmatprep.mubr.msk.f32.mxu0 %vm400_vm3, %v399_v0  ;;  %v180_v5 = vld [vmem:[%s467_s2 + $0x28] sm:$0xff]  ;;  %v177_v8 = vld [vmem:[%s467_s2 + $0x10] sm:$0xff] }
   0x3   :  { %v14_v4 = vld [vmem:[%s469_s0] sm:$0xff]  ;;  %371 = vmatpush3.msra.mxu1 %v16_v2  ;;  %372 = vmatprep.mubr.msk.f32.mxu1 %vm400_vm3, %v399_v0  ;;  %v263_v9 = vld [vmem:[%s467_s2 + $0x48] sm:$0xff]  ;;  %v172_v11 = vshrl.u32 %v171_v10, 7  ;;  %v18_v13 = vld [vmem:[%s467_s2 + $0x50] sm:$0xff] }
   0x4   :  { %368 = vmatmul.mubr.msk.f32.vlgmr.msra.gmra.mxu0 %vm19_vm1, %v15_v3  ;;  %373 = vmatmul.mubr.msk.f32.vlgmr.msra.gmra.mxu1 %vm97_vm2, %v14_v4  ;;  %v179_v6 = vld [vmem:[%s467_s2 + $0x20] sm:$0xff]  ;;  %v261_v23 = vld [vmem:[%s467_s2 + $0x38] sm:$0xff]  ;;  %v260_v24 = vld [vmem:[%s467_s2 + $0x30] sm:$0xff] }
   0x5   :  { %375 = vmatprep.subr.mxu0 %v399_v0  ;;  %383 = vmatprep.mubr.msk.f32.mxu0 %vm400_vm3, %v399_v0  ;;  %v173_v12 = vsub.s32 0, %v172_v11  ;;  %v262_v22 = vld [vmem:[%s467_s2 + $0x40] sm:$0xff]  ;;  %v183_v25 = vsub.s32 1, %v172_v11  ;;  %v266_v31 = vsub.s32 2, %v172_v11 }
   0x6   :  { %386 = vmatprep.subr.mxu1 %v399_v0  ;;  %394 = vmatprep.mubr.msk.f32.mxu1 %vm400_vm3, %v399_v0 }
   0x7   :  { %376 = vmatpush3.msra.mxu0 %v180_v5  ;;  %387 = vmatpush3.msra.mxu1 %v263_v9  ;;  %v174_v14 = vrot.slane %v18_v13, %v173_v12  ;;  %v184_v26 = vrot.slane %v18_v13, %v183_v25  ;;  %v267_v32 = vrot.slane %v18_v13, %v266_v31 }
   0x8   :  { %377 = vmatprep.subr.mxu0 %v399_v0  ;;  %388 = vmatprep.subr.mxu1 %v399_v0 }
   0x9   :  { %378 = vmatpush3.msra.mxu0 %v179_v6  ;;  %389 = vmatpush3.msra.mxu1 %v262_v22 }
   0xa   :  { %379 = vmatprep.subr.mxu0 %v399_v0  ;;  %390 = vmatprep.subr.mxu1 %v399_v0 }
   0xb   :  { %380 = vmatpush3.msra.mxu0 %v178_v7  ;;  %391 = vmatpush3.msra.mxu1 %v261_v23 }
   0xc   :  { %381 = vmatprep.subr.mxu0 %v399_v0  ;;  %392 = vmatprep.subr.mxu1 %v399_v0 }
   0xd   :  { %382 = vmatpush3.msra.mxu0 %v177_v8  ;;  %393 = vmatpush3.msra.mxu1 %v260_v24 }
  0xc4   :  { %v93_v15 = vpop.f32.mrf.mxu0  ;;  %v167_v16 = vpop.f32.mrf.mxu1 }
  0xc5   :  { %v168_v17 = vadd.f32 %v167_v16, %v93_v15 }
  0xc6   :  { %v369_v18 = vpop.f32.mrf.mxu0  ;;  %v374_v19 = vpop.f32.mrf.mxu1 }
  0xc7   :  { %v175_v20 = vadd.f32 %v174_v14, %v168_v17 }
  0xc9   :  { %v176_v21 = vmax.f32 %v175_v20, 0.0 }
  0xcb   :  { %384 = vmatmul.mubr.msk.f32.vlgmr.msra.gmra.mxu0 %vm185_vm4, %v176_v21 }
 0x18b   :  { %v255_v27 = vpop.f32.mrf.mxu0 }
 0x18c   :  { %v256_v28 = vadd.f32 %v255_v27, %v184_v26 }
 0x18d   :  { %v385_v29 = vpop.f32.mrf.mxu0 }
 0x18e   :  { %v259_v30 = vmax.f32 %v256_v28, 0.0 }
 0x190   :  { %395 = vmatmul.mubr.msk.f32.vlgmr.msra.gmra.mxu1 %vm185_vm4, %v259_v30 }
 0x250   :  { %v337_v33 = vpop.f32.mrf.mxu1 }
 0x251   :  { %v338_v34 = vadd.f32 %v337_v33, %v267_v32 }
 0x252   :  { %v396_v35 = vpop.f32.mrf.mxu1 }
 0x253   :  { %341 = vst.msk [vmem:[%s470_s3] sm:$0xff] %vm19_vm1, %v338_v34 }

</bundles_post_ra>
